<compile_context>
chip_gen: v7x
topology: tpu7x:2x2x1
jax: 0.10.0
libtpu: 0.0.40
codegen_flags: <defaults>
</compile_context>

<pallas_src>
import math

import jax
import jax.numpy as jnp
from jax.experimental import pallas as pl
from jax.experimental.pallas import tpu as pltpu

# ----------------------------- configuration --------------------------------
HIDDEN_DIMS = (8, 8, 16)          # sum = 32 = embed dim
NUM_HEADS = 4
EMBED = sum(HIDDEN_DIMS)          # 32
HEAD_DIM = EMBED // NUM_HEADS     # 8
OUT_DIM = HIDDEN_DIMS[-1]         # 16
SEQ = 8                           # L
BATCH = 2                         # N

# Parameter-slab layout (single f32 (SLAB_ROWS, 128) operand), all offsets static:
#   rows [0, E),   lanes [0, 3E)          : Wqkv = in_proj_weight^T              (E, 3E)
#   rows [E, 2E),  lanes [0, OUT)         : Wop  = out_proj^T @ output_proj^T    (E, OUT)
#   row  2E,       lanes [0, 3E)          : bqkv = in_proj_bias                  (3E,)
#   row  2E,       lanes [3E, 3E + OUT)   : bop  = bo @ output_proj^T + bp       (OUT,)
SLAB_ROWS = 72                    # 2*EMBED + 1 = 65, padded to a multiple of 8 sublanes


# ------------------------------- kernel -------------------------------------
def _cross_scale_attn_kernel(x_ref,      # (N*L, E)      flattened batch-first input
                             p_ref,      # (SLAB_ROWS, 128) packed parameter slab
                             out_ref,    # (N*L, OUT)
                             attnw_ref): # (N, L, L)
    nl, e = x_ref.shape
    n, l, _ = attnw_ref.shape
    od = out_ref.shape[-1]
    h = NUM_HEADS
    d = e // h
    scale = 1.0 / math.sqrt(d)

    x = x_ref[...]                                                   # (NL, E)

    # Static slices of the packed parameter slab.
    wqkv = p_ref[0:e, 0:3 * e]                                       # (E, 3E)
    wop = p_ref[e:2 * e, 0:od]                                       # (E, OUT)
    brow = p_ref[2 * e:2 * e + 1, :]                                 # (1, 128)
    bqkv = brow[:, 0:3 * e]                                          # (1, 3E)
    bop = brow[:, 3 * e:3 * e + od]                                  # (1, OUT)

    # --- ONE lane-dense QKV projection for all heads and batch rows ---------
    qkv = jnp.dot(x, wqkv, preferred_element_type=jnp.float32) + bqkv  # (NL, 3E)

    # Head-major (H*N, L, D) q/k/v: static lane slices + leading-dim reshapes only.
    def to_heads(block):                                             # (NL, H*D) -> (H*N, L, D)
        parts = [block[:, i * d:(i + 1) * d].reshape(n, l, d) for i in range(h)]
        return jnp.concatenate(parts, axis=0)

    q = to_heads(qkv[:, 0:e])
    k = to_heads(qkv[:, e:2 * e])
    v = to_heads(qkv[:, 2 * e:3 * e])

    # --- scaled dot-product attention, batched over (head, batch) -----------
    s = jnp.einsum("bqd,bkd->bqk", q, k,
                   preferred_element_type=jnp.float32) * scale        # (H*N, L, L)
    s = s - jnp.max(s, axis=-1, keepdims=True)
    p = jnp.exp(s)
    p = p / jnp.sum(p, axis=-1, keepdims=True)   # exact divide: attn weights returned directly

    ctx = jnp.einsum("bqk,bkd->bqd", p, v,
                     preferred_element_type=jnp.float32)              # (H*N, L, D)

    # --- re-assemble heads along lanes, ONE fused out-projection matmul -----
    ctx_flat = jnp.concatenate(
        [ctx[i * n:(i + 1) * n].reshape(nl, d) for i in range(h)], axis=-1)   # (NL, E)
    out = jnp.dot(ctx_flat, wop, preferred_element_type=jnp.float32) + bop    # (NL, OUT)

    # Attention weights averaged over heads (head-major -> static leading slices + adds).
    acc = p[0:n]
    for i in range(1, h):
        acc = acc + p[i * n:(i + 1) * n]
    attnw = acc * (1.0 / h)                                           # (N, L, L)

    out_ref[...] = out.astype(out_ref.dtype)
    attnw_ref[...] = attnw.astype(attnw_ref.dtype)


# ------------------------------- wrapper -------------------------------------
@jax.jit
def cross_scale_attention(scale_features, param_slab):
    """scale_features: list of (L, N, d_i) arrays.  Returns (output, attn_weights)
    with output (L, N, OUT_DIM) and attn_weights (N, L, L), matching PyTorch."""
    x = jnp.concatenate(scale_features, axis=-1)             # (L, N, E)
    xb = jnp.transpose(x, (1, 0, 2))                         # (N, L, E) batch-first
    n, l, e = xb.shape
    xf = xb.reshape(n * l, e)                                # (N*L, E) lane-dense 2D

    vmem = pl.BlockSpec(memory_space=pltpu.MemorySpace.VMEM)

    # Single pallas_call, no grid: the whole problem is a few KB.
    # Scaling hook (v7x): if N or L grow, add a leading grid axis over batch with
    # compiler_params=pltpu.CompilerParams(dimension_semantics=("parallel",)).
    out_f, attnw = pl.pallas_call(
        _cross_scale_attn_kernel,
        out_shape=(
            jax.ShapeDtypeStruct((n * l, OUT_DIM), jnp.float32),
            jax.ShapeDtypeStruct((n, l, l), jnp.float32),
        ),
        in_specs=[vmem, vmem],
        out_specs=(vmem, vmem),
    )(xf, param_slab)

    output = jnp.transpose(out_f.reshape(n, l, OUT_DIM), (1, 0, 2))   # (L, N, OUT)
    return output, attnw


# ------------------------- pure-JAX reference --------------------------------
def reference(scale_features, params):
    """Unfused math, mirrors PyTorch MultiheadAttention + Linear exactly."""
    x = jnp.concatenate(scale_features, axis=-1)             # (L, N, E)
    xb = jnp.transpose(x, (1, 0, 2))                         # (N, L, E)
    q = xb @ params["wq"] + params["bq"]
    k = xb @ params["wk"] + params["bk"]
    v = xb @ params["wv"] + params["bv"]

    def split(t):  # (N, L, E) -> (N, H, L, D)
        nn, ll, _ = t.shape
        return jnp.transpose(t.reshape(nn, ll, NUM_HEADS, HEAD_DIM), (0, 2, 1, 3))

    qh, kh, vh = split(q), split(k), split(v)
    s = jnp.einsum("nhqd,nhkd->nhqk", qh, kh) / math.sqrt(HEAD_DIM)
    p = jax.nn.softmax(s, axis=-1)
    ctx = jnp.einsum("nhqk,nhkd->nhqd", p, vh)               # (N, H, L, D)
    ctx = jnp.transpose(ctx, (0, 2, 1, 3)).reshape(xb.shape)  # (N, L, E)
    ao = ctx @ params["wo"] + params["bo"]
    out = ao @ params["wp"] + params["bp"]                   # (N, L, OUT)
    return jnp.transpose(out, (1, 0, 2)), jnp.mean(p, axis=1)


# ------------------------------ parameters ------------------------------------
def make_params(key):
    ks = jax.random.split(key, 6)
    scale = 0.1
    # PyTorch layouts: packed in_proj (3E, E)/(3E,), Linear weights (out, in).
    in_proj_w = scale * jax.random.normal(ks[0], (3 * EMBED, EMBED), jnp.float32)
    in_proj_b = scale * jax.random.normal(ks[1], (3 * EMBED,), jnp.float32)
    wo = scale * jax.random.normal(ks[2], (EMBED, EMBED), jnp.float32)       # attn out_proj
    bo = scale * jax.random.normal(ks[3], (EMBED,), jnp.float32)
    wp = scale * jax.random.normal(ks[4], (OUT_DIM, EMBED), jnp.float32)     # output_proj
    bp = scale * jax.random.normal(ks[5], (OUT_DIM,), jnp.float32)

    # x @ W form (in, out) for the reference.
    wq_t, wk_t, wv_t = (in_proj_w[i * EMBED:(i + 1) * EMBED].T for i in range(3))
    bq, bk, bv = (in_proj_b[i * EMBED:(i + 1) * EMBED] for i in range(3))
    wo_t, wp_t = wo.T, wp.T

    # ------------- kernel-side packed parameter slab (one operand) -------------
    wqkv = in_proj_w.T                                   # (E, 3E) = [Wq^T | Wk^T | Wv^T]
    wop = wo_t @ wp_t                                    # (E, OUT)  fused out_proj@output_proj
    bop = bo @ wp_t + bp                                 # (OUT,)    fused bias

    slab = jnp.zeros((SLAB_ROWS, 128), jnp.float32)
    slab = slab.at[0:EMBED, 0:3 * EMBED].set(wqkv)
    slab = slab.at[EMBED:2 * EMBED, 0:OUT_DIM].set(wop)
    slab = slab.at[2 * EMBED, 0:3 * EMBED].set(in_proj_b)
    slab = slab.at[2 * EMBED, 3 * EMBED:3 * EMBED + OUT_DIM].set(bop)

    return {
        # reference (unfused, PyTorch-equivalent) params
        "wq": wq_t, "bq": bq[None, :], "wk": wk_t, "bk": bk[None, :],
        "wv": wv_t, "bv": bv[None, :], "wo": wo_t, "bo": bo[None, :],
        "wp": wp_t, "bp": bp[None, :],
        # kernel (packed) params
        "pslab": slab,
    }


# --------------------------------- main ---------------------------------------
if __name__ == "__main__":
    key = jax.random.PRNGKey(0)
    k_params, *k_feats = jax.random.split(key, 1 + len(HIDDEN_DIMS))
    params = make_params(k_params)

    # scale_features: list of (L, N, d_i) — PyTorch seq-first convention.
    scale_features = [
        jax.random.normal(k, (SEQ, BATCH, d), jnp.float32)
        for k, d in zip(k_feats, HIDDEN_DIMS)
    ]

    out, attn_w = cross_scale_attention(scale_features, params["pslab"])
    jax.block_until_ready((out, attn_w))

    ref_out, ref_w = reference(scale_features, params)
    assert out.shape == (SEQ, BATCH, OUT_DIM), out.shape
    assert attn_w.shape == (BATCH, SEQ, SEQ), attn_w.shape
    assert jnp.allclose(out, ref_out, rtol=1e-3, atol=1e-3), \
        float(jnp.max(jnp.abs(out - ref_out)))
    assert jnp.allclose(attn_w, ref_w, rtol=1e-3, atol=1e-3), \
        float(jnp.max(jnp.abs(attn_w - ref_w)))

    print("KERNEL_OK")
</pallas_src>

<mosaic_0001>
module attributes {stable_mosaic.version = 11 : i64} {
  func.func @_cross_scale_attn_kernel(%arg0: memref<16x32xf32, #tpu.memory_space<vmem>>, %arg1: memref<72x128xf32, #tpu.memory_space<vmem>>, %arg2: memref<16x16xf32, #tpu.memory_space<vmem>>, %arg3: memref<2x8x8xf32, #tpu.memory_space<vmem>>) attributes {dimension_semantics = [], scalar_prefetch = 0 : i64, scratch_operands = 0 : i64, tpu.core_type = #tpu.core_type<tc>} {
    %c0 = arith.constant 0 : index
    %c0_0 = arith.constant 0 : index
    %0 = vector.load %arg0[%c0, %c0_0] : memref<16x32xf32, #tpu.memory_space<vmem>>, vector<16x32xf32>
    %c0_1 = arith.constant 0 : index
    %c0_2 = arith.constant 0 : index
    %1 = vector.load %arg1[%c0_1, %c0_2] : memref<72x128xf32, #tpu.memory_space<vmem>>, vector<32x96xf32>
    %c32 = arith.constant 32 : index
    %c0_3 = arith.constant 0 : index
    %2 = vector.load %arg1[%c32, %c0_3] : memref<72x128xf32, #tpu.memory_space<vmem>>, vector<32x16xf32>
    %c64 = arith.constant 64 : index
    %c0_4 = arith.constant 0 : index
    %3 = vector.load %arg1[%c64, %c0_4] : memref<72x128xf32, #tpu.memory_space<vmem>>, vector<1x128xf32>
    %4 = vector.extract_strided_slice %3 {offsets = [0, 0], sizes = [1, 96], strides = [1, 1]} : vector<1x128xf32> to vector<1x96xf32>
    %5 = vector.extract_strided_slice %3 {offsets = [0, 96], sizes = [1, 16], strides = [1, 1]} : vector<1x128xf32> to vector<1x16xf32>
    %cst = arith.constant dense<0.000000e+00> : vector<16x96xf32>
    %6 = tpu.matmul %0, %1, %cst {dimension_numbers = #tpu.dot_dimension_numbers<[1], [0], [0], [1], [0, 0, 1, 1], [], []>} : vector<16x32xf32>, vector<32x96xf32>, vector<16x96xf32> -> vector<16x96xf32>
    %7 = vector.broadcast %4 : vector<1x96xf32> to vector<16x96xf32>
    %8 = arith.addf %6, %7 : vector<16x96xf32>
    %9 = vector.extract_strided_slice %8 {offsets = [0, 0], sizes = [16, 32], strides = [1, 1]} : vector<16x96xf32> to vector<16x32xf32>
    %10 = vector.extract_strided_slice %9 {offsets = [0, 0], sizes = [16, 8], strides = [1, 1]} : vector<16x32xf32> to vector<16x8xf32>
    %11 = vector.shape_cast %10 : vector<16x8xf32> to vector<2x8x8xf32>
    %12 = vector.extract_strided_slice %9 {offsets = [0, 8], sizes = [16, 8], strides = [1, 1]} : vector<16x32xf32> to vector<16x8xf32>
    %13 = vector.shape_cast %12 : vector<16x8xf32> to vector<2x8x8xf32>
    %14 = vector.extract_strided_slice %9 {offsets = [0, 16], sizes = [16, 8], strides = [1, 1]} : vector<16x32xf32> to vector<16x8xf32>
    %15 = vector.shape_cast %14 : vector<16x8xf32> to vector<2x8x8xf32>
    %16 = vector.extract_strided_slice %9 {offsets = [0, 24], sizes = [16, 8], strides = [1, 1]} : vector<16x32xf32> to vector<16x8xf32>
    %17 = vector.shape_cast %16 : vector<16x8xf32> to vector<2x8x8xf32>
    %18 = tpu.concatenate %11, %13, %15, %17 in 0 : vector<2x8x8xf32>, vector<2x8x8xf32>, vector<2x8x8xf32>, vector<2x8x8xf32> -> vector<8x8x8xf32>
    %19 = vector.extract_strided_slice %8 {offsets = [0, 32], sizes = [16, 32], strides = [1, 1]} : vector<16x96xf32> to vector<16x32xf32>
    %20 = vector.extract_strided_slice %19 {offsets = [0, 0], sizes = [16, 8], strides = [1, 1]} : vector<16x32xf32> to vector<16x8xf32>
    %21 = vector.shape_cast %20 : vector<16x8xf32> to vector<2x8x8xf32>
    %22 = vector.extract_strided_slice %19 {offsets = [0, 8], sizes = [16, 8], strides = [1, 1]} : vector<16x32xf32> to vector<16x8xf32>
    %23 = vector.shape_cast %22 : vector<16x8xf32> to vector<2x8x8xf32>
    %24 = vector.extract_strided_slice %19 {offsets = [0, 16], sizes = [16, 8], strides = [1, 1]} : vector<16x32xf32> to vector<16x8xf32>
    %25 = vector.shape_cast %24 : vector<16x8xf32> to vector<2x8x8xf32>
    %26 = vector.extract_strided_slice %19 {offsets = [0, 24], sizes = [16, 8], strides = [1, 1]} : vector<16x32xf32> to vector<16x8xf32>
    %27 = vector.shape_cast %26 : vector<16x8xf32> to vector<2x8x8xf32>
    %28 = tpu.concatenate %21, %23, %25, %27 in 0 : vector<2x8x8xf32>, vector<2x8x8xf32>, vector<2x8x8xf32>, vector<2x8x8xf32> -> vector<8x8x8xf32>
    %29 = vector.extract_strided_slice %8 {offsets = [0, 64], sizes = [16, 32], strides = [1, 1]} : vector<16x96xf32> to vector<16x32xf32>
    %30 = vector.extract_strided_slice %29 {offsets = [0, 0], sizes = [16, 8], strides = [1, 1]} : vector<16x32xf32> to vector<16x8xf32>
    %31 = vector.shape_cast %30 : vector<16x8xf32> to vector<2x8x8xf32>
    %32 = vector.extract_strided_slice %29 {offsets = [0, 8], sizes = [16, 8], strides = [1, 1]} : vector<16x32xf32> to vector<16x8xf32>
    %33 = vector.shape_cast %32 : vector<16x8xf32> to vector<2x8x8xf32>
    %34 = vector.extract_strided_slice %29 {offsets = [0, 16], sizes = [16, 8], strides = [1, 1]} : vector<16x32xf32> to vector<16x8xf32>
    %35 = vector.shape_cast %34 : vector<16x8xf32> to vector<2x8x8xf32>
    %36 = vector.extract_strided_slice %29 {offsets = [0, 24], sizes = [16, 8], strides = [1, 1]} : vector<16x32xf32> to vector<16x8xf32>
    %37 = vector.shape_cast %36 : vector<16x8xf32> to vector<2x8x8xf32>
    %38 = tpu.concatenate %31, %33, %35, %37 in 0 : vector<2x8x8xf32>, vector<2x8x8xf32>, vector<2x8x8xf32>, vector<2x8x8xf32> -> vector<8x8x8xf32>
    "tpu.trace_start"() <{level = 10 : i32, message = "bqd,bkd->bqk"}> : () -> ()
    %cst_5 = arith.constant dense<0.000000e+00> : vector<8x8x8xf32>
    %39 = tpu.matmul %18, %28, %cst_5 {dimension_numbers = #tpu.dot_dimension_numbers<[2], [2], [1], [1], [0, 0, 0, 1, 1, 1], [0], [0]>} : vector<8x8x8xf32>, vector<8x8x8xf32>, vector<8x8x8xf32> -> vector<8x8x8xf32>
    "tpu.trace_stop"() : () -> ()
    %cst_6 = arith.constant 0.353553385 : f32
    %40 = vector.broadcast %cst_6 : f32 to vector<8x8x8xf32>
    %41 = arith.mulf %39, %40 : vector<8x8x8xf32>
    %cst_7 = arith.constant dense<0xFF800000> : vector<8x8xf32>
    %42 = vector.multi_reduction <maximumf>, %41, %cst_7 [2] : vector<8x8x8xf32> to vector<8x8xf32>
    %43 = vector.shape_cast %42 : vector<8x8xf32> to vector<8x8x1xf32>
    %44 = vector.broadcast %43 : vector<8x8x1xf32> to vector<8x8x8xf32>
    %45 = arith.subf %41, %44 : vector<8x8x8xf32>
    %46 = math.exp %45 : vector<8x8x8xf32>
    %cst_8 = arith.constant dense<0.000000e+00> : vector<8x8xf32>
    %47 = vector.multi_reduction <add>, %46, %cst_8 [2] : vector<8x8x8xf32> to vector<8x8xf32>
    %48 = vector.shape_cast %47 : vector<8x8xf32> to vector<8x8x1xf32>
    %49 = vector.broadcast %48 : vector<8x8x1xf32> to vector<8x8x8xf32>
    %50 = arith.divf %46, %49 : vector<8x8x8xf32>
    "tpu.trace_start"() <{level = 10 : i32, message = "bqk,bkd->bqd"}> : () -> ()
    %cst_9 = arith.constant dense<0.000000e+00> : vector<8x8x8xf32>
    %51 = tpu.matmul %50, %38, %cst_9 {dimension_numbers = #tpu.dot_dimension_numbers<[2], [1], [1], [2], [0, 0, 0, 1, 1, 2], [0], [0]>} : vector<8x8x8xf32>, vector<8x8x8xf32>, vector<8x8x8xf32> -> vector<8x8x8xf32>
    "tpu.trace_stop"() : () -> ()
    %52 = vector.extract_strided_slice %51 {offsets = [0, 0, 0], sizes = [2, 8, 8], strides = [1, 1, 1]} : vector<8x8x8xf32> to vector<2x8x8xf32>
    %53 = vector.shape_cast %52 : vector<2x8x8xf32> to vector<16x8xf32>
    %54 = vector.extract_strided_slice %51 {offsets = [2, 0, 0], sizes = [2, 8, 8], strides = [1, 1, 1]} : vector<8x8x8xf32> to vector<2x8x8xf32>
    %55 = vector.shape_cast %54 : vector<2x8x8xf32> to vector<16x8xf32>
    %56 = vector.extract_strided_slice %51 {offsets = [4, 0, 0], sizes = [2, 8, 8], strides = [1, 1, 1]} : vector<8x8x8xf32> to vector<2x8x8xf32>
    %57 = vector.shape_cast %56 : vector<2x8x8xf32> to vector<16x8xf32>
    %58 = vector.extract_strided_slice %51 {offsets = [6, 0, 0], sizes = [2, 8, 8], strides = [1, 1, 1]} : vector<8x8x8xf32> to vector<2x8x8xf32>
    %59 = vector.shape_cast %58 : vector<2x8x8xf32> to vector<16x8xf32>
    %60 = tpu.concatenate %53, %55, %57, %59 in 1 : vector<16x8xf32>, vector<16x8xf32>, vector<16x8xf32>, vector<16x8xf32> -> vector<16x32xf32>
    %cst_10 = arith.constant dense<0.000000e+00> : vector<16x16xf32>
    %61 = tpu.matmul %60, %2, %cst_10 {dimension_numbers = #tpu.dot_dimension_numbers<[1], [0], [0], [1], [0, 0, 1, 1], [], []>} : vector<16x32xf32>, vector<32x16xf32>, vector<16x16xf32> -> vector<16x16xf32>
    %62 = vector.broadcast %5 : vector<1x16xf32> to vector<16x16xf32>
    %63 = arith.addf %61, %62 : vector<16x16xf32>
    %64 = vector.extract_strided_slice %50 {offsets = [0, 0, 0], sizes = [2, 8, 8], strides = [1, 1, 1]} : vector<8x8x8xf32> to vector<2x8x8xf32>
    %65 = vector.extract_strided_slice %50 {offsets = [2, 0, 0], sizes = [2, 8, 8], strides = [1, 1, 1]} : vector<8x8x8xf32> to vector<2x8x8xf32>
    %66 = arith.addf %64, %65 : vector<2x8x8xf32>
    %67 = vector.extract_strided_slice %50 {offsets = [4, 0, 0], sizes = [2, 8, 8], strides = [1, 1, 1]} : vector<8x8x8xf32> to vector<2x8x8xf32>
    %68 = arith.addf %66, %67 : vector<2x8x8xf32>
    %69 = vector.extract_strided_slice %50 {offsets = [6, 0, 0], sizes = [2, 8, 8], strides = [1, 1, 1]} : vector<8x8x8xf32> to vector<2x8x8xf32>
    %70 = arith.addf %68, %69 : vector<2x8x8xf32>
    %cst_11 = arith.constant 2.500000e-01 : f32
    %71 = vector.broadcast %cst_11 : f32 to vector<2x8x8xf32>
    %72 = arith.mulf %70, %71 : vector<2x8x8xf32>
    %c0_12 = arith.constant 0 : index
    %c0_13 = arith.constant 0 : index
    %73 = vector.load %arg2[%c0_12, %c0_13] : memref<16x16xf32, #tpu.memory_space<vmem>>, vector<16x16xf32>
    tpu.vector_store %arg2[%c0_12, %c0_13], %63 {strides = array<i32>} : memref<16x16xf32, #tpu.memory_space<vmem>>, vector<16x16xf32>,
    %c0_14 = arith.constant 0 : index
    %c0_15 = arith.constant 0 : index
    %c0_16 = arith.constant 0 : index
    %74 = vector.load %arg3[%c0_14, %c0_15, %c0_16] : memref<2x8x8xf32, #tpu.memory_space<vmem>>, vector<2x8x8xf32>
    tpu.vector_store %arg3[%c0_14, %c0_15, %c0_16], %72 {strides = array<i32>} : memref<2x8x8xf32, #tpu.memory_space<vmem>>, vector<2x8x8xf32>,
    return
  }
}

</mosaic_0001>

<bundles_post_ra>
// kernel: cross_scale_attention.1
= control target key start
LH: loop header
LB: loop body
LE: loop exit
PB: predicated region body
PF: predicated region fallthrough
CT: control target
= control target key end

     0   :  { %vm29_vm0 = vcmask 261120   ;;  %s2109_s0 = inlined_call_operand.vmem [shape: f32[16,32], index: 0, kind: input, shape index: {}]   ;;  %s2110_s1 = inlined_call_operand.vmem [shape: f32[72,128], index: 1, kind: input, shape index: {}]   ;;  %s2111_s2 = inlined_call_operand.vmem [shape: f32[16,16], index: 2, kind: output, shape index: {0}]   ;;  %s2112_s3 = inlined_call_operand.hbm [shape: f32[2,8,8], index: 3, kind: output, shape index: {1}]  }
   0x1   :  { %v16_v0 = vld [vmem:[%s2110_s1] sm:$0xff]  ;;  %v17_v1 = vld [vmem:[%s2110_s1 + $0x8] sm:$0xff]  ;;  %v18_v2 = vld [vmem:[%s2110_s1 + $0x10] sm:$0xff] }
   0x2   :  { %v1762_v3 = vpack.c.bf16 %v17_v1, %v16_v0  ;;  %v19_v4 = vld [vmem:[%s2110_s1 + $0x18] sm:$0xff]  ;;  %v14_v5 = vld [vmem:[%s2109_s0] sm:$0xff] }
   0x3   :  { %v1766_v6 = vpack.c.bf16 %v19_v4, %v18_v2  ;;  %1668 = vmatprep.mubr.msk.f32.mxu0 %vm29_vm0, %v14_v5 }
   0x4   :  { %9 = vsyncpa [#allocation3], 0  ;;  %1763 = vmatprep.subr.bf16.mxu0 %v1762_v3  ;;  %v15_v7 = vld [vmem:[%s2109_s0 + $0x8] sm:$0xff]  ;;  %v1903_v8 = vld [vmem:[%s2110_s1 + $0x40] ss:$0 sm:$0xff]  ;;  %v1847_v10 = vmov 0.0  }
   0x5   :  { %1765 = vmatpush3.bf16.msra.mxu0 %v1762_v3  ;;  %1671 = vmatprep.subr.mxu1 %v1847_v10  ;;  %s1848_s26 = smov 112   ;;  %s1849_s0 = smov 120   ;;  %vm1850_vm1 = vmmov 0   ;;  %vm127_vm2 = vcmask 64512   ;;  %vm1464_vm3 = vcmask 130048   ;;  %vm1467_vm4 = vcmask 195584  }
   0x6   :  { %1767 = vmatprep.subr.bf16.mxu0 %v1766_v6  ;;  %1673 = vmatprep.mubr.msk.f32.mxu1 %vm1850_vm1, %v1847_v10  ;;  %s1851_s27 = smov 104   ;;  %s1852_s28 = smov 96  }
   0x7   :  { %s1853_s29 = smov 64   ;;  %s1854_s11 = smov 8  }
   0x8   :  { %s1855_s12 = smov 16   ;;  %s1856_s13 = smov 24  }
   0x9   :  { %1769 = vmatpush3.bf16.msra.mxu0 %v1766_v6  ;;  %s1858_s14 = smov [#allocation2]  }
   0xa   :  { %1691 = vmatprep.subr.mxu0 %v1847_v10  ;;  %s1574_s15 = sshll.u32 %s1858_s14, 4  ;;  %s1575_s15 = int_to_ptr.vmem [resolvable:$true] %s1574_s15 }
   0xb   :  { %s1823_s16 = scalar_lea.vmem %s1575_s15, 256  ;;  %p1828_p1 = scmp.lt.s32.totalorder %s1575_s15, %s1575_s15 }
   0xc   :  { %1669 = vmatmul.mubr.msk.f32.vlgmr.msra.gmra.mrb[0].mxu0 %vm29_vm0, %v15_v7  ;;  %p1824_p0 = scmp.ne.s32.totalorder %s1575_s15, %s1823_s16  ;;  %p1829_p2 = scmp.lt.s32.totalorder %s1823_s16, %s1823_s16 }
   0xd   :  { %1693 = vmatprep.mubr.msk.f32.mxu0 %vm1850_vm1, %v1847_v10 }
   0xe   :  { %p1830_p3 = por %p1829_p2, %p1828_p1 }
  0x10   :  { %p1831_p4 = pnand %p1830_p3, %p1824_p0 }
  0xdf   :  { %v1670_v9 = vpop.f32.mrb[0].mxu0 }
  0xe0   :  { %v102_v11 = vpop.f32.mrb[1].mxu0  ;;  %v1917_v13 = vadd.f32 %v1670_v9, %v1903_v8 }
  0xe1   :  { %v1908_v12 = vadd.f32 %v1903_v8, %v102_v11 }
  0xe3   :  { %117 = vrot.lane.b32.xlu1 %v1908_v12, %s1848_s26  ;;  %113 = vrot.lane.b32.xlu0 %v1908_v12, %s1849_s0 }
  0xe7   :  { %119 = vrot.lane.b32.xlu1 %v1917_v13, %s1848_s26  ;;  %115 = vrot.lane.b32.xlu0 %v1917_v13, %s1849_s0 }
  0xeb   :  { %123 = vrot.lane.b32.xlu1 %v1917_v13, %s1851_s27  ;;  %121 = vrot.lane.b32.xlu0 %v1908_v12, %s1851_s27 }
  0xef   :  { %202 = vrot.lane.b32.xlu1 %v1917_v13, %s1852_s28  ;;  %125 = vrot.lane.b32.xlu0 %v1908_v12, %s1852_s28 }
 0x155   :  { %v1925_v14 = vpop.permute.xlu1 %117  ;;  %v1927_v15 = vpop.permute.xlu0 %113 }
 0x156   :  { %278 = vrot.lane.b32.xlu0 %v1927_v15, %s1852_s28 }
 0x159   :  { %v1930_v16 = vpop.permute.xlu1 %119  ;;  %v1932_v17 = vpop.permute.xlu0 %115 }
 0x15a   :  { %430 = vrot.lane.b32.xlu0 %v1925_v14, %s1852_s28  ;;  %354 = vrot.lane.b32.xlu1 %v1932_v17, %s1852_s28 }
 0x15d   :  { %v1936_v18 = vpop.permute.xlu0 %121  ;;  %v1940_v19 = vpop.permute.xlu1 %123 }
 0x15e   :  { %506 = vrot.lane.b32.xlu1 %v1930_v16, %s1852_s28  ;;  %582 = vrot.lane.b32.xlu0 %v1936_v18, %s1852_s28 }
 0x161   :  { %v126_v20 = vpop.permute.xlu0 %125  ;;  %v203_v21 = vpop.permute.xlu1 %202 }
 0x162   :  { %658 = vrot.lane.b32.xlu1 %v1940_v19, %s1852_s28  ;;  %1672 = vmatpush3.xpose.msk.msra.mxu1 %vm127_vm2, %v126_v20 }
 0x163   :  { %1676 = vmatprep.subr.mxu1 %v1847_v10 }
 0x165   :  { %1674 = vmatmul.mubr.msk.f32.vlgmr.msra.gmra.mrb[0].mxu1 %vm127_vm2, %v1908_v12 }
 0x166   :  { %1677 = vmatpush3.xpose.msk.msra.mxu1 %vm127_vm2, %v203_v21  ;;  %1678 = vmatprep.mubr.msk.f32.mxu1 %vm1850_vm1, %v1847_v10 }
 0x167   :  { %1681 = vmatprep.subr.mxu1 %v1847_v10 }
 0x169   :  { %1679 = vmatmul.mubr.msk.f32.vlgmr.msra.gmra.mrb[2].mxu1 %vm127_vm2, %v1917_v13 }
 0x16a   :  { %1683 = vmatprep.mubr.msk.f32.mxu1 %vm1850_vm1, %v1847_v10 }
 0x1c8   :  { %v279_v22 = vpop.permute.xlu0 %278 }
 0x1c9   :  { %1682 = vmatpush3.xpose.msk.msra.mxu1 %vm127_vm2, %v279_v22 }
 0x1ca   :  { %1686 = vmatprep.subr.mxu1 %v1847_v10 }
 0x1cc   :  { %v355_v23 = vpop.permute.xlu1 %354  ;;  %1684 = vmatmul.mubr.msk.f32.vlgmr.msra.gmra.mrb[4].mxu1 %vm127_vm2, %v1927_v15  ;;  %v431_v24 = vpop.permute.xlu0 %430 }
 0x1cd   :  { %1687 = vmatpush3.xpose.msk.msra.mxu1 %vm127_vm2, %v355_v23  ;;  %1692 = vmatpush3.xpose.msk.msra.mxu0 %vm127_vm2, %v431_v24 }
 0x1ce   :  { %1688 = vmatprep.mubr.msk.f32.mxu1 %vm1850_vm1, %v1847_v10  ;;  %1696 = vmatprep.subr.mxu1 %v1847_v10 }
 0x1cf   :  { %1701 = vmatprep.subr.mxu0 %v1847_v10 }
 0x1d0   :  { %v507_v25 = vpop.permute.xlu1 %506  ;;  %1689 = vmatmul.mubr.msk.f32.vlgmr.msra.gmra.mrb[6].mxu1 %vm127_vm2, %v1932_v17  ;;  %1694 = vmatmul.mubr.msk.f32.vlgmr.msra.gmra.mrb[2].mxu0 %vm127_vm2, %v1925_v14  ;;  %v583_v26 = vpop.permute.xlu0 %582 }
 0x1d1   :  { %1697 = vmatpush3.xpose.msk.msra.mxu1 %vm127_vm2, %v507_v25  ;;  %1702 = vmatpush3.xpose.msk.msra.mxu0 %vm127_vm2, %v583_v26 }
 0x1d2   :  { %1698 = vmatprep.mubr.msk.f32.mxu1 %vm1850_vm1, %v1847_v10  ;;  %1703 = vmatprep.mubr.msk.f32.mxu0 %vm1850_vm1, %v1847_v10 }
 0x1d3   :  { %1706 = vmatprep.subr.mxu1 %v1847_v10  ;;  %1711 = vmatprep.subr.mxu0 %v1847_v10 }
 0x1d4   :  { %v659_v27 = vpop.permute.xlu1 %658  ;;  %1699 = vmatmul.mubr.msk.f32.vlgmr.msra.gmra.mrb[8].mxu1 %vm127_vm2, %v1930_v16  ;;  %1704 = vmatmul.mubr.msk.f32.vlgmr.msra.gmra.mrb[4].mxu0 %vm127_vm2, %v1936_v18 }
 0x1d5   :  { %1707 = vmatpush3.xpose.msk.msra.mxu1 %vm127_vm2, %v659_v27  ;;  %1708 = vmatprep.mubr.msk.f32.mxu1 %vm1850_vm1, %v1847_v10 }
 0x1d6   :  { %1716 = vmatprep.subr.mxu1 %v1847_v10  ;;  %1713 = vmatprep.mubr.msk.f32.mxu0 %vm1850_vm1, %v1847_v10 }
 0x1d8   :  { %1709 = vmatmul.mubr.msk.f32.vlgmr.msra.gmra.mrb[10].mxu1 %vm127_vm2, %v1940_v19 }
 0x1d9   :  { %1718 = vmatprep.mubr.msk.f32.mxu1 %vm1850_vm1, %v1847_v10 }
 0x238   :  { %v198_v28 = vpop.f32.mrb[0].mxu1 }
 0x239   :  { %v734_v29 = vmul.f32 0.35355338, %v198_v28  ;;  %v1675_v30 = vpop.f32.mrb[1].mxu1 }
 0x23b   :  { %v742_v31 = vsel %vm127_vm2, %v734_v29, -inf }
 0x23c   :  { %743 = vmax.xlane.f32.xlu0 %v742_v31  ;;  %v274_v32 = vpop.f32.mrb[2].mxu1 }
 0x23d   :  { %v735_v33 = vmul.f32 0.35355338, %v274_v32  ;;  %v1680_v34 = vpop.f32.mrb[3].mxu1 }
 0x23f   :  { %v745_v35 = vsel %vm127_vm2, %v735_v33, -inf }
 0x240   :  { %746 = vmax.xlane.f32.xlu1 %v745_v35 }
 0x29f   :  { %v350_v36 = vpop.f32.mrb[4].mxu1 }
 0x2a0   :  { %v736_v37 = vmul.f32 0.35355338, %v350_v36  ;;  %v1685_v38 = vpop.f32.mrb[5].mxu1 }
 0x2a2   :  { %v748_v39 = vsel %vm127_vm2, %v736_v37, -inf }
 0x2a3   :  { %749 = vmax.xlane.f32.xlu0 %v748_v39  ;;  %v426_v40 = vpop.f32.mrb[6].mxu1  ;;  %v502_v41 = vpop.f32.mrb[2].mxu0 }
 0x2a4   :  { %v737_v42 = vmul.f32 0.35355338, %v426_v40  ;;  %v738_v43 = vmul.f32 0.35355338, %v502_v41  ;;  %v1690_v44 = vpop.f32.mrb[7].mxu1  ;;  %v1695_v45 = vpop.f32.mrb[3].mxu0 }
 0x2a6   :  { %v751_v46 = vsel %vm127_vm2, %v737_v42, -inf  ;;  %v754_v47 = vsel %vm127_vm2, %v738_v43, -inf }
 0x2a7   :  { %752 = vmax.xlane.f32.xlu0 %v751_v46  ;;  %v578_v48 = vpop.f32.mrb[8].mxu1  ;;  %755 = vmax.xlane.f32.xlu1 %v754_v47  ;;  %v654_v49 = vpop.f32.mrb[4].mxu0 }
 0x2a8   :  { %v739_v50 = vmul.f32 0.35355338, %v578_v48  ;;  %v740_v51 = vmul.f32 0.35355338, %v654_v49  ;;  %v1700_v52 = vpop.f32.mrb[9].mxu1  ;;  %v1705_v53 = vpop.f32.mrb[5].mxu0 }
 0x2aa   :  { %v757_v54 = vsel %vm127_vm2, %v739_v50, -inf  ;;  %v760_v55 = vsel %vm127_vm2, %v740_v51, -inf }
 0x2ab   :  { %758 = vmax.xlane.f32.xlu0 %v757_v54  ;;  %v730_v56 = vpop.f32.mrb[10].mxu1  ;;  %761 = vmax.xlane.f32.xlu1 %v760_v55 }
 0x2ac   :  { %v741_v57 = vmul.f32 0.35355338, %v730_v56  ;;  %v1710_v58 = vpop.f32.mrb[11].mxu1 }
 0x2ae   :  { %v763_v59 = vsel %vm127_vm2, %v741_v57, -inf }
 0x2af   :  { %764 = vmax.xlane.f32.xlu0 %v763_v59 }
 0x2bc   :  { %830 = vrot.lane.b32.xlu1 %v1908_v12, %s1853_s29 }
 0x2c0   :  { %982 = vrot.lane.b32.xlu1 %v1927_v15, %s1853_s29 }
 0x2c4   :  { %1058 = vrot.lane.b32.xlu1 %v1932_v17, %s1853_s29 }
 0x2c5   :  { %906 = vrot.lane.b32.xlu0 %v1917_v13, %s1853_s29 }
 0x2c8   :  { %1210 = vrot.lane.b32.xlu1 %v1930_v16, %s1853_s29 }
 0x2c9   :  { %1134 = vrot.lane.b32.xlu0 %v1925_v14, %s1853_s29  ;;  %v744_v62 = vpop.xlane.xlu0 %743 }
 0x2ca   :  { %v766_v63 = vsub.f32 %v734_v29, %v744_v62 }
 0x2cc   :  { %v774_v1 = vmul.f32 1.442695, %v766_v63 }
 0x2cd   :  { %v747_v60 = vpop.xlane.xlu1 %746 }
 0x2ce   :  { %v767_v61 = vsub.f32 %v735_v33, %v747_v60 }
 0x2d0   :  { %v776_v0 = vmul.f32 1.442695, %v767_v61 }
 0x2d2   :  { %1791 = vpow2.f32 %v776_v0 }
 0x2d3   :  { %1793 = vpow2.f32 %v774_v1 }
 0x2dc   :  { %v2011_v2 = vpop.eup %1791 }
 0x2dd   :  { %v793_v3 = vsel %vm127_vm2, %v2011_v2, 0.0  ;;  %v2015_v4 = vpop.eup %1793 }
 0x2de   :  { %v790_v5 = vsel %vm127_vm2, %v2015_v4, 0.0 }
 0x2e8   :  { %794 = vadd.xlane.f32.xlu0 %v793_v3 }
 0x2ec   :  { %791 = vadd.xlane.f32.xlu1 %v790_v5 }
 0x330   :  { %v750_v6 = vpop.xlane.xlu0 %749 }
 0x331   :  { %v768_v7 = vsub.f32 %v736_v37, %v750_v6 }
 0x333   :  { %v778_v9 = vmul.f32 1.442695, %v768_v7 }
 0x334   :  { %v756_v11 = vpop.xlane.xlu1 %755  ;;  %v753_v12 = vpop.xlane.xlu0 %752 }
 0x335   :  { %1795 = vpow2.f32 %v778_v9  ;;  %v770_v13 = vsub.f32 %v738_v43, %v756_v11  ;;  %v769_v14 = vsub.f32 %v737_v42, %v753_v12 }
 0x337   :  { %v782_v15 = vmul.f32 1.442695, %v770_v13  ;;  %v780_v16 = vmul.f32 1.442695, %v769_v14 }
 0x338   :  { %v762_v17 = vpop.xlane.xlu1 %761  ;;  %v759_v20 = vpop.xlane.xlu0 %758 }
 0x339   :  { %1797 = vpow2.f32 %v782_v15  ;;  %v772_v21 = vsub.f32 %v740_v51, %v762_v17  ;;  %v771_v22 = vsub.f32 %v739_v50, %v759_v20 }
 0x33a   :  { %1799 = vpow2.f32 %v780_v16 }
 0x33b   :  { %v786_v23 = vmul.f32 1.442695, %v772_v21  ;;  %v784_v24 = vmul.f32 1.442695, %v771_v22  ;;  %v21_v22 = vld [vmem:[%s2110_s1 + $0x28] sm:$0xff] }
 0x33c   :  { %v831_v25 = vpop.permute.xlu1 %830  ;;  %v765_v26 = vpop.xlane.xlu0 %764 }
 0x33d   :  { %1801 = vpow2.f32 %v786_v23  ;;  %v773_v27 = vsub.f32 %v741_v57, %v765_v26  ;;  %1712 = vmatpush3.msra.mxu0 %v831_v25  ;;  %v23_v25 = vld [vmem:[%s2110_s1 + $0x38] sm:$0xff] }
 0x33e   :  { %1803 = vpow2.f32 %v784_v24  ;;  %1721 = vmatprep.subr.mxu0 %v1847_v10  ;;  %v22_v24 = vld [vmem:[%s2110_s1 + $0x30] sm:$0xff] }
 0x33f   :  { %v1796_v28 = vpop.eup %1795  ;;  %v788_v29 = vmul.f32 1.442695, %v773_v27  ;;  %v1774_v26 = vpack.c.bf16 %v23_v25, %v22_v24 }
 0x340   :  { %v907_v30 = vpop.permute.xlu0 %906  ;;  %v796_v31 = vsel %vm127_vm2, %v1796_v28, 0.0  ;;  %v983_v42 = vpop.permute.xlu1 %982 }
 0x341   :  { %1805 = vpow2.f32 %v788_v29  ;;  %797 = vadd.xlane.f32.xlu1 %v796_v31  ;;  %1717 = vmatpush3.msra.mxu1 %v907_v30 }
 0x342   :  { %1726 = vmatprep.subr.mxu1 %v1847_v10 }
 0x343   :  { %v1798_v32 = vpop.eup %1797 }
 0x344   :  { %v1800_v33 = vpop.eup %1799  ;;  %v802_v34 = vsel %vm127_vm2, %v1798_v32, 0.0  ;;  %v1059_v43 = vpop.permute.xlu1 %1058 }
 0x345   :  { %803 = vadd.xlane.f32.xlu1 %v802_v34  ;;  %v799_v35 = vsel %vm127_vm2, %v1800_v33, 0.0  ;;  %v1135_v44 = vpop.permute.xlu0 %1134 }
 0x346   :  { %800 = vadd.xlane.f32.xlu0 %v799_v35 }
 0x347   :  { %v1802_v36 = vpop.eup %1801 }
 0x348   :  { %v2024_v37 = vpop.eup %1803  ;;  %v808_v38 = vsel %vm127_vm2, %v1802_v36, 0.0  ;;  %v1211_v45 = vpop.permute.xlu1 %1210 }
 0x349   :  { %809 = vadd.xlane.f32.xlu1 %v808_v38  ;;  %v805_v39 = vsel %vm127_vm2, %v2024_v37, 0.0 }
 0x34a   :  { %806 = vadd.xlane.f32.xlu0 %v805_v39 }
 0x34b   :  { %v2029_v40 = vpop.eup %1805 }
 0x34c   :  { %v811_v41 = vsel %vm127_vm2, %v2029_v40, 0.0 }
 0x34e   :  { %812 = vadd.xlane.f32.xlu0 %v811_v41 }
 0x35a   :  { %1362 = vrot.lane.b32.xlu1 %v1940_v19, %s1853_s29 }
 0x364   :  { %1286 = vrot.lane.b32.xlu0 %v1936_v18, %s1853_s29 }
 0x375   :  { %v795_v46 = vpop.xlane.xlu0 %794 }
 0x376   :  { %1807 = vrcp.f32 %v795_v46 }
 0x379   :  { %v792_v47 = vpop.xlane.xlu1 %791 }
 0x37a   :  { %1809 = vrcp.f32 %v792_v47 }
 0x380   :  { %v1808_v48 = vpop.eup %1807 }
 0x381   :  { %v817_v49 = vmul.f32 %v1808_v48, %v2011_v2 }
 0x383   :  { %1719 = vmatmul.mubr.msk.f32.vlgmr.msra.gmra.mrb[12].mxu1 %vm127_vm2, %v817_v49 }
 0x384   :  { %v1810_v50 = vpop.eup %1809  ;;  %1727 = vmatpush3.msra.mxu1 %v1059_v43  ;;  %1728 = vmatprep.mubr.msk.f32.mxu1 %vm1850_vm1, %v1847_v10 }
 0x385   :  { %v815_v18 = vmul.f32 %v1810_v50, %v2015_v4  ;;  %1736 = vmatprep.subr.mxu1 %v1847_v10 }
 0x387   :  { %1714 = vmatmul.mubr.msk.f32.vlgmr.msra.gmra.mrb[6].mxu0 %vm127_vm2, %v815_v18 }
 0x388   :  { %1722 = vmatpush3.msra.mxu0 %v983_v42  ;;  %1723 = vmatprep.mubr.msk.f32.mxu0 %vm1850_vm1, %v1847_v10 }
 0x389   :  { %1731 = vmatprep.subr.mxu0 %v1847_v10 }
 0x3ce   :  { %v798_v19 = vpop.xlane.xlu1 %797 }
 0x3cf   :  { %1811 = vrcp.f32 %v798_v19 }
 0x3d2   :  { %v804_v51 = vpop.xlane.xlu1 %803 }
 0x3d3   :  { %1813 = vrcp.f32 %v804_v51  ;;  %v801_v52 = vpop.xlane.xlu0 %800 }
 0x3d4   :  { %1815 = vrcp.f32 %v801_v52 }
 0x3d6   :  { %v810_v53 = vpop.xlane.xlu1 %809 }
 0x3d7   :  { %1817 = vrcp.f32 %v810_v53  ;;  %v807_v54 = vpop.xlane.xlu0 %806 }
 0x3d8   :  { %1819 = vrcp.f32 %v807_v54 }
 0x3d9   :  { %v1812_v55 = vpop.eup %1811 }
 0x3da   :  { %v819_v56 = vmul.f32 %v1812_v55, %v1796_v28  ;;  %v1363_v7 = vpop.permute.xlu1 %1362 }
 0x3db   :  { %v813_v57 = vpop.xlane.xlu0 %812 }
 0x3dc   :  { %1821 = vrcp.f32 %v813_v57  ;;  %1724 = vmatmul.mubr.msk.f32.vlgmr.msra.gmra.mrb[8].mxu0 %vm127_vm2, %v819_v56  ;;  %v1555_v63 = vadd.f32 %v819_v56, %v815_v18 }
 0x3dd   :  { %v1814_v58 = vpop.eup %1813  ;;  %1732 = vmatpush3.msra.mxu0 %v1135_v44  ;;  %1733 = vmatprep.mubr.msk.f32.mxu0 %vm1850_vm1, %v1847_v10 }
 0x3de   :  { %v1816_v59 = vpop.eup %1815  ;;  %v823_v60 = vmul.f32 %v1814_v58, %v1798_v32  ;;  %1741 = vmatprep.subr.mxu0 %v1847_v10 }
 0x3df   :  { %v821_v61 = vmul.f32 %v1816_v59, %v1800_v33  ;;  %v1287_v62 = vpop.permute.xlu0 %1286 }
 0x3e0   :  { %1734 = vmatmul.mubr.msk.f32.vlgmr.msra.gmra.mrb[10].mxu0 %vm127_vm2, %v823_v60  ;;  %v1557_v3 = vadd.f32 %v1555_v63, %v823_v60 }
 0x3e1   :  { %v1818_v0 = vpop.eup %1817  ;;  %1729 = vmatmul.mubr.msk.f32.vlgmr.msra.gmra.mrb[14].mxu1 %vm127_vm2, %v821_v61  ;;  %1742 = vmatpush3.msra.mxu0 %v1287_v62  ;;  %v1556_v6 = vadd.f32 %v821_v61, %v817_v49 }
 0x3e2   :  { %v1820_v1 = vpop.eup %1819  ;;  %v827_v2 = vmul.f32 %v1818_v0, %v1802_v36  ;;  %1737 = vmatpush3.msra.mxu1 %v1211_v45  ;;  %1738 = vmatprep.mubr.msk.f32.mxu1 %vm1850_vm1, %v1847_v10 }
 0x3e3   :  { %v825_v4 = vmul.f32 %v1820_v1, %v2024_v37  ;;  %1743 = vmatprep.mubr.msk.f32.mxu0 %vm1850_vm1, %v1847_v10  ;;  %1746 = vmatprep.subr.mxu1 %v1847_v10 }
 0x3e4   :  { %1744 = vmatmul.mubr.msk.f32.vlgmr.msra.gmra.mrb[12].mxu0 %vm127_vm2, %v827_v2  ;;  %v1559_v5 = vadd.f32 %v1557_v3, %v827_v2 }
 0x3e5   :  { %1739 = vmatmul.mubr.msk.f32.vlgmr.msra.gmra.mrb[16].mxu1 %vm127_vm2, %v825_v4  ;;  %v1558_v13 = vadd.f32 %v1556_v6, %v825_v4 }
 0x3e6   :  { %v1822_v9 = vpop.eup %1821  ;;  %1747 = vmatpush3.msra.mxu1 %v1363_v7  ;;  %1748 = vmatprep.mubr.msk.f32.mxu1 %vm1850_vm1, %v1847_v10  ;;  %v1561_v11 = vmul.f32 0.25, %v1559_v5  ;;  %v20_v10 = vld [vmem:[%s2110_s1 + $0x20] sm:$0xff]  ;;  %s1857_s1 = smov 32  }
 0x3e7   :  { %v829_v12 = vmul.f32 %v1822_v9, %v2029_v40  ;;  %v1770_v23 = vpack.c.bf16 %v21_v22, %v20_v10 }
 0x3e8   :  { %1565 = vst.msk [vmem:[#allocation2] sm:$0xff] %vm127_vm2, %v1561_v11 }
 0x3e9   :  { %1749 = vmatmul.mubr.msk.f32.vlgmr.msra.gmra.mrb[18].mxu1 %vm127_vm2, %v829_v12  ;;  %v1560_v14 = vadd.f32 %v1558_v13, %v829_v12  ;;  %1771 = vmatprep.subr.bf16.mxu0 %v1770_v23 }
 0x3ea   :  { %1773 = vmatpush3.bf16.msra.mxu0 %v1770_v23 }
 0x3eb   :  { %v1562_v15 = vmul.f32 0.25, %v1560_v14  ;;  %1775 = vmatprep.subr.bf16.mxu0 %v1774_v26 }
 0x3ed   :  { %1566 = vst.msk [vmem:[#allocation2 + $0x8] sm:$0xff] %vm127_vm2, %v1562_v15 }
 0x3ee   :  { %1777 = vmatpush3.bf16.msra.mxu0 %v1774_v26 }
 0x456   :  { %v978_v16 = vpop.f32.mrb[12].mxu1 }
 0x457   :  { %v1720_v17 = vpop.f32.mrb[13].mxu1 }
 0x45a   :  { %v902_v20 = vpop.f32.mrb[6].mxu0 }
 0x45b   :  { %v1715_v21 = vpop.f32.mrb[7].mxu0 }
 0x4af   :  { %v1054_v27 = vpop.f32.mrb[8].mxu0 }
 0x4b0   :  { %v1725_v28 = vpop.f32.mrb[9].mxu0  ;;  %1440 = vrot.lane.b32.xlu0 %v1054_v27, %s1854_s11 }
 0x4b3   :  { %v1206_v29 = vpop.f32.mrb[10].mxu0 }
 0x4b4   :  { %v1130_v30 = vpop.f32.mrb[14].mxu1  ;;  %1448 = vrot.lane.b32.xlu0 %v1206_v29, %s1855_s12  ;;  %v1735_v31 = vpop.f32.mrb[11].mxu0 }
 0x4b5   :  { %1442 = vrot.lane.b32.xlu1 %v1130_v30, %s1854_s11  ;;  %v1730_v32 = vpop.f32.mrb[15].mxu1 }
 0x4b7   :  { %v1358_v33 = vpop.f32.mrb[12].mxu0 }
 0x4b8   :  { %v1282_v34 = vpop.f32.mrb[16].mxu1  ;;  %1456 = vrot.lane.b32.xlu0 %v1358_v33, %s1856_s13  ;;  %v1745_v35 = vpop.f32.mrb[13].mxu0 }
 0x4b9   :  { %1450 = vrot.lane.b32.xlu1 %v1282_v34, %s1855_s12  ;;  %v1740_v36 = vpop.f32.mrb[17].mxu1 }
 0x4bc   :  { %v1434_v37 = vpop.f32.mrb[18].mxu1  ;;  %1471 = vrot.lane.b32.xlu0 %v1903_v8, %s1857_s1 }
 0x4bd   :  { %1458 = vrot.lane.b32.xlu1 %v1434_v37, %s1856_s13  ;;  %v1750_v38 = vpop.f32.mrb[19].mxu1 }
 0x522   :  { %v1441_v39 = vpop.permute.xlu0 %1440 }
 0x523   :  { %v1462_v42 = vsel %vm127_vm2, %v902_v20, %v1441_v39 }
 0x526   :  { %v1449_v40 = vpop.permute.xlu0 %1448 }
 0x527   :  { %v1443_v41 = vpop.permute.xlu1 %1442  ;;  %v1465_v43 = vsel %vm1464_vm3, %v1462_v42, %v1449_v40 }
 0x528   :  { %v1463_v47 = vsel %vm127_vm2, %v978_v16, %v1443_v41 }
 0x52a   :  { %v1457_v44 = vpop.permute.xlu0 %1456 }
 0x52b   :  { %v1451_v45 = vpop.permute.xlu1 %1450  ;;  %v1468_v46 = vsel %vm1467_vm4, %v1465_v43, %v1457_v44 }
 0x52c   :  { %1759 = vmatprep.mubr.msk.f32.mxu0 %vm29_vm0, %v1468_v46  ;;  %v1466_v8 = vsel %vm1464_vm3, %v1463_v47, %v1451_v45 }
 0x52f   :  { %v1459_v48 = vpop.permute.xlu1 %1458 }
 0x530   :  { %v1469_v49 = vsel %vm1467_vm4, %v1466_v8, %v1459_v48 }
 0x531   :  { %1760 = vmatmul.mubr.msk.f32.vlgmr.msra.gmra.mrb[14].mxu0 %vm29_vm0, %v1469_v49 }
 0x532   :  { %1834 = shalt.err (!%p1831_p4)
}
 0x533   :  { %s1835_s19 = scalar_lea.hbm %s2112_s3, 256 }
 0x534   :  { %p1836_p5 = scmp.ne.s32.totalorder %s2112_s3, %s1835_s19  ;;  %p1839_p6 = scmp.lt.u32.totalorder %s1835_s19, %s2112_s3 }
 0x536   :  { %p1841_p7 = pnand %p1839_p6, %p1836_p5 }
 0x538   :  { %1844 = shalt.err (!%p1841_p7)
}
 0x539   :  { %s1859_s24 = smov 128   ;;  %v1472_v50 = vpop.permute.xlu0 %1471 }
 0x53a   :  { %1580 = dma.vmem_to_hbm [thread:$0]  %s1575_s15, 256, %s2112_s3, [#allocation3], %s1859_s24, %s1859_s24, %s1854_s11  }
 0x604   :  { %v1761_v18 = vpop.f32.mrb[14].mxu0 }
 0x605   :  { %v1552_v19 = vadd.f32 %v1761_v18, %v1472_v50  ;;  %v1546_v51 = vpop.f32.mrb[15].mxu0 }
 0x606   :  { %v1547_v52 = vadd.f32 %v1546_v51, %v1472_v50 }
 0x607   :  { %1564 = vst.msk [vmem:[%s2111_s2 + $0x8] sm:$0xff] %vm1464_vm3, %v1552_v19 }
 0x608   :  { %1563 = vst.msk [vmem:[%s2111_s2] sm:$0xff] %vm1464_vm3, %v1547_v52 }
 0x609   :  { %1845 = dma.done.wait [#allocation3], 256  }
 0x60a   :  { %1846 = vsyncadd [#allocation3], 4294967040 }
 0x60b   :  { %1586 = vsyncpa [#allocation3], 1 }

</bundles_post_ra>
